<compile_context>
chip_gen: v7x
topology: tpu7x:2x2x1
jax: 0.10.0
libtpu: 0.0.40
codegen_flags: <defaults>
</compile_context>

<pallas_src>
import functools

import jax
import jax.numpy as jnp
from jax import lax
from jax.experimental import pallas as pl
from jax.experimental.pallas import tpu as pltpu

EPS = 1e-5
NEG_SLOPE = 0.2


def _round_up(x, m):
    return ((x + m - 1) // m) * m


def _vmem_capacity_bytes():
    try:
        return int(pltpu.get_tpu_info().vmem_capacity_bytes)
    except Exception:
        return 64 * 1024 * 1024  # conservative fallback (v7x physical size)


def _choose_thw(hw, kp, cp, budget_bytes):
    """Spatial (Ho*Wo) tile length: lane-dense (mult of 128, prefer 256), as large as the
    VMEM budget allows, never padding beyond a single tile."""
    fixed = 2 * kp * cp * 2 + 64 * 1024           # double-buffered bf16 weight + small refs
    per_row = 2 * (2 * kp)                        # patches tile (bf16), double-buffered
    per_row += 2 * (4 * cp)                       # output tile (f32), double-buffered
    per_row += 2 * (4 * cp)                       # in-kernel f32 temporaries (conv + transposed)
    avail = max(budget_bytes - fixed, 1 << 20)
    t = int(avail // per_row)
    hw_cap = _round_up(hw, 128)
    t = min(t, hw_cap, 2048)
    if t >= 256 and t != hw_cap:
        t = (t // 256) * 256                      # fill the 256-wide MXU on v6e/v7x
    else:
        t = max(128, (t // 128) * 128)
    return t


def _unet_down_kernel(patches_ref, w_ref, gamma_ref, beta_ref, out_ref,
                      sum_ref, sumsq_ref, *, inv_count, cout_p):
    phase = pl.program_id(0)
    first = (phase == 0) & (pl.program_id(1) == 0) & (pl.program_id(2) == 0)

    @pl.when(first)
    def _init():
        sum_ref[...] = jnp.zeros_like(sum_ref)
        sumsq_ref[...] = jnp.zeros_like(sumsq_ref)

    # (t_hw, Kp) bf16 x (Kp, Cp) bf16 -> f32 on the MXU.
    conv = jnp.dot(patches_ref[0], w_ref[...], preferred_element_type=jnp.float32)

    @pl.when(phase == 0)
    def _accumulate_stats():
        sum_ref[...] += jnp.sum(conv, axis=0, keepdims=True)
        sumsq_ref[...] += jnp.sum(conv * conv, axis=0, keepdims=True)

    @pl.when(phase == 1)
    def _bn_lrelu_store():
        mean = sum_ref[...] * inv_count
        var = jnp.maximum(sumsq_ref[...] * inv_count - mean * mean, 0.0)  # biased, PyTorch BN
        inv_std = lax.rsqrt(var + EPS)
        scale = gamma_ref[...] * inv_std                 # (1, Cp)
        shift = beta_ref[...] - mean * scale             # (1, Cp)
        y = conv * scale + shift                         # (t_hw, Cp), one FMA/elem
        y = jnp.where(y > 0.0, y, NEG_SLOPE * y)
        # In-kernel (XLU) transpose -> (C, HW) tile: output is already NCHW-ordered in HBM,
        # no XLA transpose pass afterwards.
        out_ref[0] = y.T[:cout_p].astype(out_ref.dtype)


@jax.jit
def unet_down(x_nchw, weight, gamma, beta):
    """x_nchw: (N, Cin, H, W); weight: (Cout, Cin, 4, 4); gamma/beta: (Cout,). Returns NCHW."""
    n, cin, h, w = x_nchw.shape
    cout = weight.shape[0]
    ho, wo = h // 2, w // 2
    hw = ho * wo
    k = cin * 16

    kp = _round_up(k, 128)          # MXU / lane alignment for the contraction dim
    cp = _round_up(cout, 128)       # lane-dense matmul result
    cout_p = _round_up(cout, 8)     # only sublane-pad the stored channel dim (slice ~free)

    vmem_limit = min(_vmem_capacity_bytes() * 3 // 4, 100 * 1024 * 1024)
    t_hw = _choose_thw(hw, kp, cp, vmem_limit - 2 * 1024 * 1024)
    hwp = _round_up(hw, t_hw)

    # im2col via XLA patches op; channel-major (cin, kh, kw) matches PyTorch weight flatten.
    # Cast to bf16 first so the materialized patches are half-width in HBM.
    x_bf16 = x_nchw.astype(jnp.bfloat16)
    patches = lax.conv_general_dilated_patches(
        x_bf16, (4, 4), (2, 2), ((1, 1), (1, 1)),
        dimension_numbers=("NCHW", "OIHW", "NHWC"))          # (N, Ho, Wo, Cin*16)
    patches = patches.reshape(n, hw, k)
    patches = jnp.pad(patches, ((0, 0), (0, hwp - hw), (0, kp - k)))   # zeros: no stat effect

    w_mat = weight.reshape(cout, k).T.astype(jnp.bfloat16)    # (K, Cout)
    w_mat = jnp.pad(w_mat, ((0, kp - k), (0, cp - cout)))

    gamma_p = jnp.pad(gamma.astype(jnp.float32), (0, cp - cout)).reshape(1, cp)
    beta_p = jnp.pad(beta.astype(jnp.float32), (0, cp - cout)).reshape(1, cp)

    grid = (2, n, hwp // t_hw)      # (phase, batch, hw-tile); phase 0 = stats, phase 1 = output
    kernel = functools.partial(_unet_down_kernel,
                               inv_count=1.0 / float(n * hw),
                               cout_p=cout_p)

    out = pl.pallas_call(
        kernel,
        out_shape=jax.ShapeDtypeStruct((n, cout_p, hwp), jnp.float32),
        grid=grid,
        in_specs=[
            pl.BlockSpec((1, t_hw, kp), lambda p, b, i: (b, i, 0)),   # patches tile (re-read in ph.1)
            pl.BlockSpec((kp, cp), lambda p, b, i: (0, 0)),           # weight (constant block)
            pl.BlockSpec((1, cp), lambda p, b, i: (0, 0)),            # gamma
            pl.BlockSpec((1, cp), lambda p, b, i: (0, 0)),            # beta
        ],
        # Pin the output block to (0,0,0) during phase 0 so the untouched buffer is never
        # flushed; phase 1 writes each block exactly once (flash-attention-style deferral).
        out_specs=pl.BlockSpec((1, cout_p, t_hw), lambda p, b, i: (b * p, 0, i * p)),
        scratch_shapes=[pltpu.VMEM((1, cp), jnp.float32),             # per-channel sum
                        pltpu.VMEM((1, cp), jnp.float32)],            # per-channel sum of squares
        compiler_params=pltpu.CompilerParams(
            # Phase axis and the resident stats scratch require sequential execution.
            # TODO(synk): v7x megacore split with per-core partial stats.
            dimension_semantics=("arbitrary", "arbitrary", "arbitrary"),
            vmem_limit_bytes=vmem_limit,
        ),
    )(patches, w_mat, gamma_p, beta_p)

    # Output is already channel-major: just strip padding and split HW -> (Ho, Wo).
    out = out[:, :cout, :hw]
    return out.reshape(n, cout, ho, wo)


def _reference(x_nchw, weight, gamma, beta, operand_dtype=jnp.float32):
    conv = lax.conv_general_dilated(
        x_nchw.astype(operand_dtype), weight.astype(operand_dtype),
        window_strides=(2, 2), padding=((1, 1), (1, 1)),
        dimension_numbers=("NCHW", "OIHW", "NCHW"),
        preferred_element_type=jnp.float32).astype(jnp.float32)
    mean = conv.mean(axis=(0, 2, 3), keepdims=True)
    var = conv.var(axis=(0, 2, 3), keepdims=True)              # biased, like PyTorch train-mode BN
    y = (conv - mean) * lax.rsqrt(var + EPS)
    y = y * gamma.reshape(1, -1, 1, 1) + beta.reshape(1, -1, 1, 1)
    return jnp.where(y > 0, y, NEG_SLOPE * y)


if __name__ == "__main__":
    key = jax.random.PRNGKey(0)
    k_x, k_w, k_g, k_b = jax.random.split(key, 4)

    N, CIN, H, W = 2, 4, 16, 16
    COUT = 8

    x = jax.random.normal(k_x, (N, CIN, H, W), dtype=jnp.float32)
    weight = jax.random.normal(k_w, (COUT, CIN, 4, 4), dtype=jnp.float32) * 0.1
    gamma = 1.0 + 0.1 * jax.random.normal(k_g, (COUT,), dtype=jnp.float32)
    beta = 0.1 * jax.random.normal(k_b, (COUT,), dtype=jnp.float32)

    out = unet_down(x, weight, gamma, beta)
    out = jax.block_until_ready(out)
    assert out.shape == (N, COUT, H // 2, W // 2), out.shape

    # Strict check against a reference using the same bf16 MXU operand precision.
    ref_bf16 = _reference(x, weight, gamma, beta, operand_dtype=jnp.bfloat16)
    err_bf16 = float(jnp.max(jnp.abs(out - ref_bf16)))
    assert err_bf16 < 2e-3, f"bf16-matched reference mismatch: {err_bf16}"

    # Loose check against the pure-f32 (PyTorch-semantics) reference: only bf16 operand
    # rounding in the conv differs.
    ref_f32 = _reference(x, weight, gamma, beta, operand_dtype=jnp.float32)
    err_f32 = float(jnp.max(jnp.abs(out - ref_f32)))
    assert err_f32 < 1.5e-1, f"f32 reference mismatch: {err_f32}"

    print("KERNEL_OK")
</pallas_src>

<mosaic_0001>
module attributes {stable_mosaic.version = 11 : i64} {
  func.func @_unet_down_kernel(%arg0: i32, %arg1: i32, %arg2: i32, %arg3: memref<1x128x128xbf16, #tpu.memory_space<vmem>>, %arg4: memref<128x128xbf16, #tpu.memory_space<vmem>>, %arg5: memref<1x128xf32, #tpu.memory_space<vmem>>, %arg6: memref<1x128xf32, #tpu.memory_space<vmem>>, %arg7: memref<1x8x128xf32, #tpu.memory_space<vmem>>, %arg8: memref<1x128xf32, #tpu.memory_space<vmem>>, %arg9: memref<1x128xf32, #tpu.memory_space<vmem>>) attributes {dimension_semantics = [#tpu.dimension_semantics<arbitrary>, #tpu.dimension_semantics<arbitrary>, #tpu.dimension_semantics<arbitrary>], iteration_bounds = array<i64: 2, 2, 1>, scalar_prefetch = 0 : i64, scratch_operands = 2 : i64, tpu.core_type = #tpu.core_type<tc>, window_params = [{transform_indices = @transform_0, window_bounds = array<i64: 1, 128, 128>}, {pipeline_mode = #tpu.pipeline_mode<synchronous>, transform_indices = @transform_1, window_bounds = array<i64: 128, 128>}, {pipeline_mode = #tpu.pipeline_mode<synchronous>, transform_indices = @transform_2, window_bounds = array<i64: 1, 128>}, {pipeline_mode = #tpu.pipeline_mode<synchronous>, transform_indices = @transform_3, window_bounds = array<i64: 1, 128>}, {transform_indices = @transform_4, window_bounds = array<i64: 1, 8, 128>}]} {
    %c0_i32 = arith.constant 0 : i32
    %0 = arith.cmpi eq, %arg0, %c0_i32 : i32
    %c0_i32_0 = arith.constant 0 : i32
    %1 = arith.cmpi eq, %arg1, %c0_i32_0 : i32
    %2 = arith.andi %0, %1 : i1
    %c0_i32_1 = arith.constant 0 : i32
    %3 = arith.cmpi eq, %arg2, %c0_i32_1 : i32
    %4 = arith.andi %2, %3 : i1
    %5 = arith.extui %4 : i1 to i32
    %c0_i32_2 = arith.constant 0 : i32
    %6 = arith.cmpi ne, %5, %c0_i32_2 : i32
    scf.if %6 {
      %cst_10 = arith.constant 0.000000e+00 : f32
      %17 = vector.broadcast %cst_10 : f32 to vector<1x128xf32>
      %c0_11 = arith.constant 0 : index
      %c0_12 = arith.constant 0 : index
      %18 = vector.load %arg8[%c0_11, %c0_12] : memref<1x128xf32, #tpu.memory_space<vmem>>, vector<1x128xf32>
      tpu.vector_store %arg8[%c0_11, %c0_12], %17 {strides = array<i32>} : memref<1x128xf32, #tpu.memory_space<vmem>>, vector<1x128xf32>,
      %cst_13 = arith.constant 0.000000e+00 : f32
      %19 = vector.broadcast %cst_13 : f32 to vector<1x128xf32>
      %c0_14 = arith.constant 0 : index
      %c0_15 = arith.constant 0 : index
      %20 = vector.load %arg9[%c0_14, %c0_15] : memref<1x128xf32, #tpu.memory_space<vmem>>, vector<1x128xf32>
      tpu.vector_store %arg9[%c0_14, %c0_15], %19 {strides = array<i32>} : memref<1x128xf32, #tpu.memory_space<vmem>>, vector<1x128xf32>,
    } else {
    }
    %c0 = arith.constant 0 : index
    %c0_3 = arith.constant 0 : index
    %c0_4 = arith.constant 0 : index
    %7 = vector.load %arg3[%c0, %c0_3, %c0_4] : memref<1x128x128xbf16, #tpu.memory_space<vmem>>, vector<1x128x128xbf16>
    %8 = vector.shape_cast %7 : vector<1x128x128xbf16> to vector<128x128xbf16>
    %c0_5 = arith.constant 0 : index
    %c0_6 = arith.constant 0 : index
    %9 = vector.load %arg4[%c0_5, %c0_6] : memref<128x128xbf16, #tpu.memory_space<vmem>>, vector<128x128xbf16>
    %cst = arith.constant dense<0.000000e+00> : vector<128x128xf32>
    %10 = tpu.matmul %8, %9, %cst {dimension_numbers = #tpu.dot_dimension_numbers<[1], [0], [0], [1], [0, 0, 1, 1], [], []>} : vector<128x128xbf16>, vector<128x128xbf16>, vector<128x128xf32> -> vector<128x128xf32>
    %c0_i32_7 = arith.constant 0 : i32
    %11 = arith.cmpi eq, %arg0, %c0_i32_7 : i32
    %12 = arith.extui %11 : i1 to i32
    %c0_i32_8 = arith.constant 0 : i32
    %13 = arith.cmpi ne, %12, %c0_i32_8 : i32
    scf.if %13 {
      %c0_10 = arith.constant 0 : index
      %c0_11 = arith.constant 0 : index
      %17 = vector.load %arg8[%c0_10, %c0_11] : memref<1x128xf32, #tpu.memory_space<vmem>>, vector<1x128xf32>
      %cst_12 = arith.constant dense<0.000000e+00> : vector<128xf32>
      %18 = vector.multi_reduction <add>, %10, %cst_12 [0] : vector<128x128xf32> to vector<128xf32>
      %19 = vector.shape_cast %18 : vector<128xf32> to vector<1x128xf32>
      %20 = arith.addf %17, %19 : vector<1x128xf32>
      %c0_13 = arith.constant 0 : index
      %c0_14 = arith.constant 0 : index
      %21 = vector.load %arg8[%c0_13, %c0_14] : memref<1x128xf32, #tpu.memory_space<vmem>>, vector<1x128xf32>
      tpu.vector_store %arg8[%c0_13, %c0_14], %20 {strides = array<i32>} : memref<1x128xf32, #tpu.memory_space<vmem>>, vector<1x128xf32>,
      %c0_15 = arith.constant 0 : index
      %c0_16 = arith.constant 0 : index
      %22 = vector.load %arg9[%c0_15, %c0_16] : memref<1x128xf32, #tpu.memory_space<vmem>>, vector<1x128xf32>
      %23 = arith.mulf %10, %10 : vector<128x128xf32>
      %cst_17 = arith.constant dense<0.000000e+00> : vector<128xf32>
      %24 = vector.multi_reduction <add>, %23, %cst_17 [0] : vector<128x128xf32> to vector<128xf32>
      %25 = vector.shape_cast %24 : vector<128xf32> to vector<1x128xf32>
      %26 = arith.addf %22, %25 : vector<1x128xf32>
      %c0_18 = arith.constant 0 : index
      %c0_19 = arith.constant 0 : index
      %27 = vector.load %arg9[%c0_18, %c0_19] : memref<1x128xf32, #tpu.memory_space<vmem>>, vector<1x128xf32>
      tpu.vector_store %arg9[%c0_18, %c0_19], %26 {strides = array<i32>} : memref<1x128xf32, #tpu.memory_space<vmem>>, vector<1x128xf32>,
    } else {
    }
    %c1_i32 = arith.constant 1 : i32
    %14 = arith.cmpi eq, %arg0, %c1_i32 : i32
    %15 = arith.extui %14 : i1 to i32
    %c0_i32_9 = arith.constant 0 : i32
    %16 = arith.cmpi ne, %15, %c0_i32_9 : i32
    scf.if %16 {
      %c0_10 = arith.constant 0 : index
      %c0_11 = arith.constant 0 : index
      %17 = vector.load %arg8[%c0_10, %c0_11] : memref<1x128xf32, #tpu.memory_space<vmem>>, vector<1x128xf32>
      %cst_12 = arith.constant 7.812500e-03 : f32
      %18 = vector.broadcast %cst_12 : f32 to vector<1x128xf32>
      %19 = arith.mulf %17, %18 : vector<1x128xf32>
      %c0_13 = arith.constant 0 : index
      %c0_14 = arith.constant 0 : index
      %20 = vector.load %arg9[%c0_13, %c0_14] : memref<1x128xf32, #tpu.memory_space<vmem>>, vector<1x128xf32>
      %cst_15 = arith.constant 7.812500e-03 : f32
      %21 = vector.broadcast %cst_15 : f32 to vector<1x128xf32>
      %22 = arith.mulf %20, %21 : vector<1x128xf32>
      %23 = arith.mulf %19, %19 : vector<1x128xf32>
      %24 = arith.subf %22, %23 : vector<1x128xf32>
      %cst_16 = arith.constant 0.000000e+00 : f32
      %25 = vector.broadcast %cst_16 : f32 to vector<1x128xf32>
      %26 = arith.maximumf %24, %25 : vector<1x128xf32>
      %cst_17 = arith.constant 9.99999974E-6 : f32
      %27 = vector.broadcast %cst_17 : f32 to vector<1x128xf32>
      %28 = arith.addf %26, %27 : vector<1x128xf32>
      %29 = math.rsqrt %28 : vector<1x128xf32>
      %c0_18 = arith.constant 0 : index
      %c0_19 = arith.constant 0 : index
      %30 = vector.load %arg5[%c0_18, %c0_19] : memref<1x128xf32, #tpu.memory_space<vmem>>, vector<1x128xf32>
      %31 = arith.mulf %30, %29 : vector<1x128xf32>
      %c0_20 = arith.constant 0 : index
      %c0_21 = arith.constant 0 : index
      %32 = vector.load %arg6[%c0_20, %c0_21] : memref<1x128xf32, #tpu.memory_space<vmem>>, vector<1x128xf32>
      %33 = arith.mulf %19, %31 : vector<1x128xf32>
      %34 = arith.subf %32, %33 : vector<1x128xf32>
      %35 = vector.broadcast %31 : vector<1x128xf32> to vector<128x128xf32>
      %36 = arith.mulf %10, %35 : vector<128x128xf32>
      %37 = vector.broadcast %34 : vector<1x128xf32> to vector<128x128xf32>
      %38 = arith.addf %36, %37 : vector<128x128xf32>
      %cst_22 = arith.constant 0.000000e+00 : f32
      %39 = vector.broadcast %cst_22 : f32 to vector<128x128xf32>
      %40 = arith.cmpf ogt, %38, %39 : vector<128x128xf32>
      %cst_23 = arith.constant 2.000000e-01 : f32
      %41 = vector.broadcast %cst_23 : f32 to vector<128x128xf32>
      %42 = arith.mulf %41, %38 : vector<128x128xf32>
      %43 = arith.select %40, %38, %42 : vector<128x128xi1>, vector<128x128xf32>
      %44 = tpu.transpose %43, [1, 0] : vector<128x128xf32> -> vector<128x128xf32>
      %45 = vector.extract_strided_slice %44 {offsets = [0, 0], sizes = [8, 128], strides = [1, 1]} : vector<128x128xf32> to vector<8x128xf32>
      %c0_24 = arith.constant 0 : index
      %c0_25 = arith.constant 0 : index
      %c0_26 = arith.constant 0 : index
      %46 = vector.load %arg7[%c0_24, %c0_25, %c0_26] : memref<1x8x128xf32, #tpu.memory_space<vmem>>, vector<1x8x128xf32>
      %47 = vector.shape_cast %46 : vector<1x8x128xf32> to vector<8x128xf32>
      %48 = vector.shape_cast %45 : vector<8x128xf32> to vector<1x8x128xf32>
      tpu.vector_store %arg7[%c0_24, %c0_25, %c0_26], %48 {strides = array<i32>} : memref<1x8x128xf32, #tpu.memory_space<vmem>>, vector<1x8x128xf32>,
    } else {
    }
    return
  }
  func.func @transform_0(%arg0: i32, %arg1: i32, %arg2: i32) -> (i32, i32, i32) {
    %c0_i32 = arith.constant 0 : i32
    %c0_i32_0 = arith.constant 0 : i32
    return %arg1, %arg2, %c0_i32 : i32, i32, i32
  }
  func.func @transform_1(%arg0: i32, %arg1: i32, %arg2: i32) -> (i32, i32) {
    %c0_i32 = arith.constant 0 : i32
    %c0_i32_0 = arith.constant 0 : i32
    %c0_i32_1 = arith.constant 0 : i32
    return %c0_i32, %c0_i32_0 : i32, i32
  }
  func.func @transform_2(%arg0: i32, %arg1: i32, %arg2: i32) -> (i32, i32) {
    %c0_i32 = arith.constant 0 : i32
    %c0_i32_0 = arith.constant 0 : i32
    %c0_i32_1 = arith.constant 0 : i32
    return %c0_i32, %c0_i32_0 : i32, i32
  }
  func.func @transform_3(%arg0: i32, %arg1: i32, %arg2: i32) -> (i32, i32) {
    %c0_i32 = arith.constant 0 : i32
    %c0_i32_0 = arith.constant 0 : i32
    %c0_i32_1 = arith.constant 0 : i32
    return %c0_i32, %c0_i32_0 : i32, i32
  }
  func.func @transform_4(%arg0: i32, %arg1: i32, %arg2: i32) -> (i32, i32, i32) {
    %0 = arith.muli %arg1, %arg0 : i32
    %1 = arith.muli %arg2, %arg0 : i32
    %c0_i32 = arith.constant 0 : i32
    %c0_i32_0 = arith.constant 0 : i32
    return %0, %c0_i32, %1 : i32, i32, i32
  }
}

</mosaic_0001>

<bundles_post_ra>
// kernel: unet_down.1
= control target key start
LH: loop header
LB: loop body
LE: loop exit
PB: predicated region body
PF: predicated region fallthrough
CT: control target
= control target key end

     0   :  { %s1005_s15 = smov 0   ;;  %s1007_s16 = smov 0   ;;  %s1237_s0 = inlined_call_operand.vmem [shape: bf16[2,128,128], index: 0, kind: input, shape index: {}]   ;;  %s1238_s1 = inlined_call_operand.vmem [shape: bf16[128,128], index: 1, kind: input, shape index: {}]   ;;  %s1239_s2 = inlined_call_operand.vmem [shape: f32[1,128], index: 2, kind: input, shape index: {}]   ;;  %s1240_s3 = inlined_call_operand.vmem [shape: f32[1,128], index: 3, kind: input, shape index: {}]   ;;  %s1241_s4 = inlined_call_operand.vmem [shape: f32[2,8,128], index: 4, kind: output, shape index: {}]  }
   0x1   :  { %s1009_s17 = smov 0   ;;  %s1011_s18 = smov 0  }
   0x2   :  { %s1013_s19 = smov 0  }
   0x3 LB: > { %s29_s20 = sadd.s32 1, %s969_s17  ;;  %s33_s21 = sadd.s32 1, %s973_s18  ;;  %s977_s19 = sphi %s1013_s19, %s14_s19   ;;  %s973_s18 = sphi %s1011_s18, %s1245_s18   ;;  %s969_s17 = sphi %s1009_s17, %s1244_s17   ;;  %s965_s16 = sphi %s1007_s16, %s1243_s16   ;;  %s961_s15 = sphi %s1005_s15, %s1242_s15  }
   0x4   : > { %p31_p0 = scmp.ge.s32.totalorder %s29_s20, 2  ;;  %p790_p1 = scmp.ge.s32.totalorder %s977_s19, 1 }
   0x5   : > { %p194_p2 = scmp.lt.s32.totalorder %s977_s19, 5 }
   0x6   : > { %s1247_s20 = smov (%p31_p0, %s29_s20), 0  ;;  %s1249_s21 = smov (!%p31_p0, %s33_s21), %s973_s18 }
   0x7   : > { %p195_p3 = pnand %p790_p1, %p194_p2  ;;  %p35_p4 = scmp.ge.s32.totalorder %s1249_s21, 2 }
   0x8   : > { %p229_p5 = scmp.lt.s32.totalorder (!%p195_p3), %s961_s15, 1  ;;  %s238_s22 = smul.u32 (!%p195_p3), %s961_s15, %s965_s16 }
   0x9   : > { %s1251_s21 = smov (%p35_p4, %s1249_s21), 0  ;;  %198 = sbr.rel (%p195_p3) target bundleno = 490 (0x1ea), region = 36 }
   0xa   : > { %p250_p6 = scmp.eq.s32.totalorder (!%p195_p3), %s965_s16, 0  ;;  %p251_p7 = scmp.eq.s32.totalorder (!%p195_p3), %s961_s15, 0 }
   0xb   : > { %p240_p8 = scmp.lt.s32.totalorder (!%p195_p3), %s238_s22, 1 }
   0xc   : > { %p252_p9 = pnand (!%p195_p3), %p251_p7, %p250_p6 }
  0x10   : > { %s1253_s15 = smov (!%p229_p5, %s961_s15), 1  ;;  %s1255_s22 = smov (!%p240_p8, %s238_s22), 1 }
  0x11   : > { %s815_s23 = sshll.u32 %s1253_s15, 6  ;;  %s793_s27 = sshll.u32 %s1255_s22, 3  ;;  %v979_v0 = vmov (!%p252_p9), 0.0  }
  0x12   : > { %s1042_s26 = scalar_lea.vmem %s1237_s0, %s815_s23  ;;  %s1047_s30 = scalar_lea.vmem %s1241_s4, %s793_s27  ;;  %259 = vst [vmem:[#allocation2] sm:$0x1] (!%p252_p9), %v979_v0  ;;  %260 = vst [vmem:[#allocation3] sm:$0x1] (!%p252_p9), %v979_v0 }
  0x13   : > { %258 = sbr.rel (%p252_p9) target bundleno = 26 (0x1a), region = 40 }
  0x1a PF: > { %v921_v1 = vld [vmem:[%s1238_s1] sm:$0xff]   ;;  %v922_v2 = vld [vmem:[%s1238_s1 + $0x8] sm:$0xff]   ;;  %v923_v3 = vld [vmem:[%s1238_s1 + $0x10] sm:$0xff]   ;;  %p811_p10 = scmp.ne.s32.totalorder %s965_s16, 0 }
  0x1b   : > { %832 = vmatprep.subr.bf16.mxu0 %v921_v1  ;;  %864 = vmatprep.subr.bf16.mxu1 %v921_v1  ;;  %v924_v4 = vld [vmem:[%s1238_s1 + $0x18] sm:$0xff]   ;;  %v929_v5 = vld [vmem:[%s1042_s26] sm:$0xff]   ;;  %v926_v8 = vld [vmem:[%s1238_s1 + $0x28] sm:$0xff]  }
  0x1c   : > { %833 = vmatpush3.bf16.msra.mxu0 %v921_v1  ;;  %872 = vmatpush3.bf16.msra.mxu1 %v921_v1  ;;  %v930_v6 = vld [vmem:[%s1042_s26 + $0x20] sm:$0xff]   ;;  %v927_v9 = vld [vmem:[%s1238_s1 + $0x30] sm:$0xff]   ;;  %v928_v10 = vld [vmem:[%s1238_s1 + $0x38] sm:$0xff]  }
  0x1d   : > { %834 = vmatprep.subr.bf16.mxu0 %v922_v2  ;;  %865 = vmatprep.subr.bf16.mxu1 %v922_v2  ;;  %v925_v7 = vld [vmem:[%s1238_s1 + $0x20] sm:$0xff]   ;;  %v931_v11 = vld [vmem:[%s1042_s26 + $0x8] sm:$0xff]   ;;  %v933_v13 = vld [vmem:[%s1042_s26 + $0x10] sm:$0xff]  }
  0x1e   : > { %848 = vmatprep.mubr.bf16.mxu0 %v929_v5  ;;  %856 = vmatprep.mubr.bf16.mxu1 %v930_v6  ;;  %v932_v12 = vld [vmem:[%s1042_s26 + $0x28] sm:$0xff]   ;;  %v934_v14 = vld [vmem:[%s1042_s26 + $0x30] sm:$0xff]   ;;  %v935_v15 = vld [vmem:[%s1042_s26 + $0x18] sm:$0xff]  }
  0x1f   : > { %v936_v16 = vld [vmem:[%s1042_s26 + $0x38] sm:$0xff]  }
  0x20   : > { %835 = vmatpush3.bf16.msra.mxu0 %v922_v2  ;;  %873 = vmatpush3.bf16.msra.mxu1 %v922_v2 }
  0x21   : > { %836 = vmatprep.subr.bf16.mxu0 %v923_v3  ;;  %866 = vmatprep.subr.bf16.mxu1 %v923_v3 }
  0x24   : > { %837 = vmatpush3.bf16.msra.mxu0 %v923_v3  ;;  %874 = vmatpush3.bf16.msra.mxu1 %v923_v3 }
  0x25   : > { %838 = vmatprep.subr.bf16.mxu0 %v924_v4  ;;  %867 = vmatprep.subr.bf16.mxu1 %v924_v4 }
  0x28   : > { %839 = vmatpush3.bf16.msra.mxu0 %v924_v4  ;;  %875 = vmatpush3.bf16.msra.mxu1 %v924_v4 }
  0x29   : > { %840 = vmatprep.subr.bf16.mxu0 %v925_v7  ;;  %868 = vmatprep.subr.bf16.mxu1 %v925_v7 }
  0x2c   : > { %841 = vmatpush3.bf16.msra.mxu0 %v925_v7  ;;  %876 = vmatpush3.bf16.msra.mxu1 %v925_v7 }
  0x2d   : > { %842 = vmatprep.subr.bf16.mxu0 %v926_v8  ;;  %869 = vmatprep.subr.bf16.mxu1 %v926_v8 }
  0x30   : > { %843 = vmatpush3.bf16.msra.mxu0 %v926_v8  ;;  %877 = vmatpush3.bf16.msra.mxu1 %v926_v8 }
  0x31   : > { %844 = vmatprep.subr.bf16.mxu0 %v927_v9  ;;  %870 = vmatprep.subr.bf16.mxu1 %v927_v9 }
  0x34   : > { %845 = vmatpush3.bf16.msra.mxu0 %v927_v9  ;;  %878 = vmatpush3.bf16.msra.mxu1 %v927_v9 }
  0x35   : > { %846 = vmatprep.subr.bf16.mxu0 %v928_v10  ;;  %871 = vmatprep.subr.bf16.mxu1 %v928_v10 }
  0x38   : > { %847 = vmatpush3.bf16.msra.mxu0 %v928_v10  ;;  %879 = vmatpush3.bf16.msra.mxu1 %v928_v10 }
  0x3b   : > { %849 = vmatmul.mubr.bf16.vlgmr.msra.gmra.mrb[0].mxu0 %v931_v11  ;;  %857 = vmatmul.mubr.bf16.vlgmr.msra.gmra.mrb[0].mxu1 %v932_v12 }
  0x3c   : > { %852 = vmatprep.mubr.bf16.mxu0 %v933_v13  ;;  %860 = vmatprep.mubr.bf16.mxu1 %v934_v14 }
  0x43   : > { %853 = vmatmul.mubr.bf16.gmra.mrb[4].mxu0 %v935_v15  ;;  %861 = vmatmul.mubr.bf16.gmra.mrb[4].mxu1 %v936_v16 }
 0x10e   : > { %v1081_v17 = vpop.f32.mrb[0].mxu0  ;;  %v1083_v18 = vpop.f32.mrb[0].mxu1 }
 0x10f   : > { %v1085_v19 = vpop.f32.mrb[1].mxu0  ;;  %v1087_v20 = vpop.f32.mrb[1].mxu1  ;;  %v516_v37 = vmul.f32 (!%p811_p10), %v1081_v17, %v1081_v17  ;;  %v524_v60 = vmul.f32 (!%p811_p10), %v1083_v18, %v1083_v18 }
 0x110   : > { %v1089_v21 = vpop.f32.mrb[2].mxu0  ;;  %v1091_v22 = vpop.f32.mrb[2].mxu1  ;;  %v514_v34 = vmul.f32 (!%p811_p10), %v1085_v19, %v1085_v19  ;;  %v522_v54 = vmul.f32 (!%p811_p10), %v1087_v20, %v1087_v20 }
 0x111   : > { %v1093_v23 = vpop.f32.mrb[3].mxu0  ;;  %v1095_v24 = vpop.f32.mrb[3].mxu1  ;;  %v517_v39 = vmul.f32 (!%p811_p10), %v1089_v21, %v1089_v21  ;;  %v525_v63 = vmul.f32 (!%p811_p10), %v1091_v22, %v1091_v22 }
 0x112   : > { %v490_v33 = vadd.f32 (!%p811_p10), %v1093_v23, %v1085_v19  ;;  %v515_v35 = vmul.f32 (!%p811_p10), %v1093_v23, %v1093_v23  ;;  %v523_v57 = vmul.f32 (!%p811_p10), %v1095_v24, %v1095_v24 }
 0x113   : > { %488 = sbr.rel (%p811_p10) target bundleno = 321 (0x141), region = 44 }
 0x114   : > { %v491_v36 = vadd.f32 (!%p811_p10), %v1081_v17, %v490_v33  ;;  %v530_v40 = vadd.f32 (!%p811_p10), %v515_v35, %v514_v34 }
 0x116   : > { %v1097_v25 = vpop.f32.mrb[4].mxu0  ;;  %v1099_v26 = vpop.f32.mrb[4].mxu1  ;;  %v492_v38 = vadd.f32 (!%p811_p10), %v1089_v21, %v491_v36  ;;  %v531_v43 = vadd.f32 (!%p811_p10), %v530_v40, %v516_v37 }
 0x117   : > { %v1101_v27 = vpop.f32.mrb[5].mxu0  ;;  %v1103_v28 = vpop.f32.mrb[5].mxu1  ;;  %v520_v48 = vmul.f32 (!%p811_p10), %v1097_v25, %v1097_v25  ;;  %v528_v8 = vmul.f32 (!%p811_p10), %v1099_v26, %v1099_v26 }
 0x118   : > { %v1105_v29 = vpop.f32.mrb[6].mxu0  ;;  %v1107_v30 = vpop.f32.mrb[6].mxu1  ;;  %v493_v41 = vadd.f32 (!%p811_p10), %v492_v38, %v1101_v27  ;;  %v518_v42 = vmul.f32 (!%p811_p10), %v1101_v27, %v1101_v27  ;;  %v532_v46 = vadd.f32 (!%p811_p10), %v531_v43, %v517_v39  ;;  %v526_v2 = vmul.f32 (!%p811_p10), %v1103_v28, %v1103_v28  ;;  %v489_v39 = vld [vmem:[#allocation2] sm:$0x1] (!%p811_p10) }
 0x119   : > { %v1109_v31 = vpop.f32.mrb[7].mxu0  ;;  %v1111_v32 = vpop.f32.mrb[7].mxu1  ;;  %v521_v51 = vmul.f32 (!%p811_p10), %v1105_v29, %v1105_v29  ;;  %v529_v11 = vmul.f32 (!%p811_p10), %v1107_v30, %v1107_v30 }
 0x11a   : > { %v494_v44 = vadd.f32 %v493_v41, %v1109_v31  ;;  %v519_v45 = vmul.f32 %v1109_v31, %v1109_v31  ;;  %v533_v49 = vadd.f32 %v532_v46, %v518_v42  ;;  %v527_v5 = vmul.f32 %v1111_v32, %v1111_v32 }
 0x11c   : > { %v495_v47 = vadd.f32 %v1097_v25, %v494_v44  ;;  %v534_v52 = vadd.f32 %v533_v49, %v519_v45  ;;  %v513_v44 = vld [vmem:[#allocation3] sm:$0x1] }
 0x11e   : > { %v496_v50 = vadd.f32 %v1105_v29, %v495_v47  ;;  %v535_v55 = vadd.f32 %v534_v52, %v520_v48 }
 0x120   : > { %v497_v53 = vadd.f32 %v496_v50, %v1087_v20  ;;  %v536_v58 = vadd.f32 %v535_v55, %v521_v51 }
 0x122   : > { %v498_v56 = vadd.f32 %v497_v53, %v1095_v24  ;;  %v537_v61 = vadd.f32 %v536_v58, %v522_v54 }
 0x124   : > { %v499_v59 = vadd.f32 %v1083_v18, %v498_v56  ;;  %v538_v0 = vadd.f32 %v537_v61, %v523_v57 }
 0x126   : > { %v500_v62 = vadd.f32 %v1091_v22, %v499_v59  ;;  %v539_v3 = vadd.f32 %v538_v0, %v524_v60 }
 0x128   : > { %v501_v1 = vadd.f32 %v500_v62, %v1103_v28  ;;  %v540_v6 = vadd.f32 %v539_v3, %v525_v63 }
 0x12a   : > { %v502_v4 = vadd.f32 %v501_v1, %v1111_v32  ;;  %v541_v9 = vadd.f32 %v540_v6, %v526_v2 }
 0x12c   : > { %v503_v7 = vadd.f32 %v1099_v26, %v502_v4  ;;  %v542_v12 = vadd.f32 %v541_v9, %v527_v5 }
 0x12e   : > { %v504_v10 = vadd.f32 %v1107_v30, %v503_v7  ;;  %v543_v14 = vadd.f32 %v542_v12, %v528_v8 }
 0x130   : > { %v505_v13 = vrot.slane %v504_v10, 4  ;;  %v544_v16 = vadd.f32 %v543_v14, %v529_v11 }
 0x132   : > { %v506_v15 = vadd.f32 %v505_v13, %v504_v10  ;;  %v545_v34 = vrot.slane %v544_v16, 4 }
 0x134   : > { %v507_v33 = vrot.slane %v506_v15, 2  ;;  %v546_v36 = vadd.f32 %v545_v34, %v544_v16 }
 0x136   : > { %v508_v35 = vadd.f32 %v507_v33, %v506_v15  ;;  %v547_v38 = vrot.slane %v546_v36, 2 }
 0x138   : > { %v509_v37 = vrot.slane %v508_v35, 1  ;;  %v548_v41 = vadd.f32 %v547_v38, %v546_v36 }
 0x13a   : > { %v510_v40 = vadd.f32 %v509_v37, %v508_v35  ;;  %v549_v43 = vrot.slane %v548_v41, 1 }
 0x13c   : > { %v511_v42 = vadd.f32 %v510_v40, %v489_v39  ;;  %v550_v45 = vadd.f32 %v549_v43, %v548_v41 }
 0x13e   : > { %512 = vst [vmem:[#allocation2] sm:$0x1] %v511_v42  ;;  %v551_v46 = vadd.f32 %v550_v45, %v513_v44 }
 0x140   : > { %552 = vst [vmem:[#allocation3] sm:$0x1] %v551_v46 }
 0x141 PF: > { %p812_p11 = scmp.ne.s32.totalorder %s965_s16, 1 }
 0x142   : > { %v572_v55 = vlaneseq (!%p812_p11)  ;;  %v566_v57 = vld [vmem:[%s1239_s2] sm:$0x1] (!%p812_p11) }
 0x143   : > { %556 = sbr.rel (%p812_p11) target bundleno = 490 (0x1ea), region = 48  ;;  %v568_v61 = vld [vmem:[%s1240_s3] sm:$0x1] (!%p812_p11) }
 0x144   : > { %v573_v56 = vshrl.u32 (!%p812_p11), %v572_v55, 7 }
 0x145   : > { %v557_v47 = vld [vmem:[#allocation2] sm:$0x1] (!%p812_p11) }
 0x146   : > { %v558_v49 = vmul.f32 (!%p812_p11), 0.0078125, %v557_v47  ;;  %v574_v58 = vsub.s32 (!%p812_p11), 0, %v573_v56 }
 0x147   : > { %v559_v48 = vld [vmem:[#allocation3] sm:$0x1] (!%p812_p11) }
 0x148   : > { %v560_v50 = vmul.f32 (!%p812_p11), 0.0078125, %v559_v48  ;;  %v561_v51 = vmul.f32 (!%p812_p11), %v558_v49, %v558_v49 }
 0x14a   : > { %v562_v52 = vsub.f32 %v560_v50, %v561_v51 }
 0x14c   : > { %v563_v53 = vmax.f32 %v562_v52, 0.0 }
 0x14e   : > { %v564_v54 = vadd.f32 1e-05, %v563_v53 }
 0x150   : > { %937 = vrsqrt.f32 %v564_v54 }
 0x15a   : > { %v938_v59 = vpop.eup %937 }
 0x15b   : > { %v567_v60 = vmul.f32 %v938_v59, %v566_v57 }
 0x15d   : > { %v569_v62 = vmul.f32 %v567_v60, %v558_v49  ;;  %v1169_v63 = vrot.slane %v567_v60, %v574_v58 }
 0x15f   : > { %v570_v0 = vsub.f32 %v568_v61, %v569_v62  ;;  %v577_v1 = vmul.f32 %v1169_v63, %v1085_v19  ;;  %v578_v2 = vmul.f32 %v1169_v63, %v1093_v23  ;;  %v579_v4 = vmul.f32 %v1081_v17, %v1169_v63 }
 0x160   : > { %v580_v7 = vmul.f32 %v1089_v21, %v1169_v63  ;;  %v581_v17 = vmul.f32 %v1169_v63, %v1101_v27  ;;  %v582_v15 = vmul.f32 %v1169_v63, %v1109_v31  ;;  %v583_v35 = vmul.f32 %v1097_v25, %v1169_v63 }
 0x161   : > { %v1175_v3 = vrot.slane %v570_v0, %v574_v58  ;;  %v584_v38 = vmul.f32 %v1105_v29, %v1169_v63  ;;  %v585_v41 = vmul.f32 %v1169_v63, %v1087_v20  ;;  %v586_v44 = vmul.f32 %v1169_v63, %v1095_v24 }
 0x162   : > { %v587_v47 = vmul.f32 %v1083_v18, %v1169_v63  ;;  %v588_v50 = vmul.f32 %v1091_v22, %v1169_v63  ;;  %v589_v53 = vmul.f32 %v1169_v63, %v1103_v28  ;;  %v590_v56 = vmul.f32 %v1169_v63, %v1111_v32 }
 0x163   : > { %v599_v5 = vadd.f32 %v1175_v3, %v577_v1  ;;  %v600_v6 = vadd.f32 %v1175_v3, %v578_v2  ;;  %v601_v19 = vadd.f32 %v1175_v3, %v579_v4  ;;  %v602_v12 = vadd.f32 %v1175_v3, %v580_v7 }
 0x164   : > { %v603_v21 = vadd.f32 %v1175_v3, %v581_v17  ;;  %v604_v34 = vadd.f32 %v1175_v3, %v582_v15  ;;  %v605_v37 = vadd.f32 %v1175_v3, %v583_v35  ;;  %v606_v40 = vadd.f32 %v1175_v3, %v584_v38 }
 0x165   : > { %vm615_vm0 = vcmp.gt.f32.partialorder %v599_v5, 0.0  ;;  %v631_v8 = vmul.f32 0.2, %v599_v5  ;;  %v632_v9 = vmul.f32 0.2, %v600_v6  ;;  %vm616_vm1 = vcmp.gt.f32.partialorder %v600_v6, 0.0 }
 0x166   : > { %v633_v11 = vmul.f32 0.2, %v601_v19  ;;  %vm617_vm2 = vcmp.gt.f32.partialorder %v601_v19, 0.0  ;;  %v634_v14 = vmul.f32 0.2, %v602_v12  ;;  %vm618_vm3 = vcmp.gt.f32.partialorder %v602_v12, 0.0 }
 0x167   : > { %v647_v10 = vsel %vm615_vm0, %v599_v5, %v631_v8  ;;  %v648_v23 = vsel %vm616_vm1, %v600_v6, %v632_v9  ;;  %v635_v33 = vmul.f32 0.2, %v603_v21  ;;  %vm619_vm4 = vcmp.gt.f32.partialorder %v603_v21, 0.0 }
 0x168   : > { %663 = vxpose.xlu0.b32.start [1/16] (narrow) %v647_v10, 8  ;;  %v649_v13 = vsel %vm617_vm2, %v601_v19, %v633_v11  ;;  %v650_v16 = vsel %vm618_vm3, %v602_v12, %v634_v14  ;;  %v636_v36 = vmul.f32 0.2, %v604_v34  ;;  %vm620_vm5 = vcmp.gt.f32.partialorder %v604_v34, 0.0 }
 0x169   : > { %v651_v27 = vsel %vm619_vm4, %v603_v21, %v635_v33  ;;  %v637_v39 = vmul.f32 0.2, %v605_v37  ;;  %vm621_vm6 = vcmp.gt.f32.partialorder %v605_v37, 0.0  ;;  %v638_v42 = vmul.f32 0.2, %v606_v40 }
 0x16a   : > { %v652_v31 = vsel %vm620_vm5, %v604_v34, %v636_v36  ;;  %v607_v43 = vadd.f32 %v1175_v3, %v585_v41  ;;  %vm622_vm7 = vcmp.gt.f32.partialorder %v606_v40, 0.0  ;;  %v608_v46 = vadd.f32 %v1175_v3, %v586_v44 }
 0x16b   : > { %v653_v25 = vsel %vm621_vm6, %v605_v37, %v637_v39  ;;  %v654_v29 = vsel %vm622_vm7, %v606_v40, %v638_v42  ;;  %v609_v49 = vadd.f32 %v1175_v3, %v587_v47  ;;  %v610_v52 = vadd.f32 %v1175_v3, %v588_v50 }
 0x16c   : > { %664 = vxpose.xlu0.b32.cont [2/16] (narrow) %v648_v23, 8  ;;  %v639_v45 = vmul.f32 0.2, %v607_v43  ;;  %vm623_vm8 = vcmp.gt.f32.partialorder %v607_v43, 0.0  ;;  %v640_v48 = vmul.f32 0.2, %v608_v46  ;;  %v611_v55 = vadd.f32 %v1175_v3, %v589_v53 }
 0x16d   : > { %vm624_vm9 = vcmp.gt.f32.partialorder %v608_v46, 0.0  ;;  %v641_v51 = vmul.f32 0.2, %v609_v49  ;;  %vm625_vm10 = vcmp.gt.f32.partialorder %v609_v49, 0.0  ;;  %v642_v54 = vmul.f32 0.2, %v610_v52 }
 0x16e   : > { %v655_v20 = vsel %vm623_vm8, %v607_v43, %v639_v45  ;;  %v656_v24 = vsel %vm624_vm9, %v608_v46, %v640_v48  ;;  %vm626_vm11 = vcmp.gt.f32.partialorder %v610_v52, 0.0  ;;  %v643_v57 = vmul.f32 0.2, %v611_v55 }
 0x16f   : > { %v657_v18 = vsel %vm625_vm10, %v609_v49, %v641_v51  ;;  %v658_v22 = vsel %vm626_vm11, %v610_v52, %v642_v54  ;;  %v612_v58 = vadd.f32 %v1175_v3, %v590_v56  ;;  %v591_v59 = vmul.f32 %v1099_v26, %v1169_v63 }
 0x170   : > { %665 = vxpose.xlu0.b32.cont [3/16] (narrow) %v649_v13, 8  ;;  %vm627_vm12 = vcmp.gt.f32.partialorder %v611_v55, 0.0  ;;  %v592_v62 = vmul.f32 %v1107_v30, %v1169_v63 }
 0x171   : > { %v659_v28 = vsel %vm627_vm12, %v611_v55, %v643_v57  ;;  %v644_v60 = vmul.f32 0.2, %v612_v58  ;;  %v613_v61 = vadd.f32 %v1175_v3, %v591_v59  ;;  %vm628_vm13 = vcmp.gt.f32.partialorder %v612_v58, 0.0 }
 0x172   : > { %v614_v1 = vadd.f32 %v1175_v3, %v592_v62 }
 0x173   : > { %v660_v32 = vsel %vm628_vm13, %v612_v58, %v644_v60  ;;  %v645_v0 = vmul.f32 0.2, %v613_v61  ;;  %vm629_vm14 = vcmp.gt.f32.partialorder %v613_v61, 0.0 }
 0x174   : > { %666 = vxpose.xlu0.b32.cont [4/16] (narrow) %v650_v16, 8  ;;  %v646_v26 = vmul.f32 0.2, %v614_v1  ;;  %vm630_vm15 = vcmp.gt.f32.partialorder %v614_v1, 0.0 }
 0x175   : > { %v661_v2 = vsel %vm629_vm14, %v613_v61, %v645_v0 }
 0x176   : > { %v662_v4 = vsel %vm630_vm15, %v614_v1, %v646_v26 }
 0x178   : > { %667 = vxpose.xlu0.b32.cont [5/16] (narrow) %v651_v27, 8 }
 0x17c   : > { %668 = vxpose.xlu0.b32.cont [6/16] (narrow) %v652_v31, 8 }
 0x180   : > { %669 = vxpose.xlu0.b32.cont [7/16] (narrow) %v653_v25, 8 }
 0x184   : > { %670 = vxpose.xlu0.b32.cont [8/16] (narrow) %v654_v29, 8 }
 0x188   : > { %671 = vxpose.xlu0.b32.cont [9/16] (narrow) %v655_v20, 8 }
 0x18c   : > { %672 = vxpose.xlu0.b32.cont [10/16] (narrow) %v656_v24, 8 }
 0x190   : > { %673 = vxpose.xlu0.b32.cont [11/16] (narrow) %v657_v18, 8 }
 0x194   : > { %674 = vxpose.xlu0.b32.cont [12/16] (narrow) %v658_v22, 8 }
 0x198   : > { %675 = vxpose.xlu0.b32.cont [13/16] (narrow) %v659_v28, 8 }
 0x19c   : > { %676 = vxpose.xlu0.b32.cont [14/16] (narrow) %v660_v32, 8 }
 0x1a0   : > { %677 = vxpose.xlu0.b32.cont [15/16] (narrow) %v661_v2, 8 }
 0x1a4   : > { %678 = vxpose.xlu0.b32.end [16/16] (narrow) %v662_v4, 8 }
 0x1e8   : > { %v679_v5 = vpop.trf.xlu0 }
 0x1e9   : > { %695 = vst [vmem:[%s1047_s30] sm:$0xff] %v679_v5 }
 0x1ea PF: > { %s14_s19 = sadd.s32 1, %s977_s19   ;;  %s1242_s15 = smov %s969_s17 }
 0x1eb   : > { %p11_p12 = scmp.ge.s32.totalorder %s14_s19, 6   ;;  %s1243_s16 = smov %s973_s18 }
 0x1ec   : > { %s1244_s17 = smov %s1247_s20  ;;  %s1245_s18 = smov %s1251_s21 }
 0x1ed   :  { %13 = sbr.rel (!%p11_p12) target bundleno = 3 (0x3), region = 78 }

</bundles_post_ra>
